<compile_context>
chip_gen: v5e
topology: v5e:2x2
jax: 0.10.0
libtpu: 0.0.40
codegen_flags: <defaults>
</compile_context>

<pallas_src>
import functools

import jax
import jax.numpy as jnp
import numpy as np
from jax.experimental import pallas as pl
from jax.experimental.pallas import tpu as pltpu


def _classifier_kernel(feat_ref, query_ref, logits_ref, pred_ref, *, num_tools):
    # feat_ref  : (TB, D)  bf16  raw (unnormalized) image features for this batch tile
    # query_ref : (TP, D)  bf16  L2-normalized text queries, zero-padded to TP (>=128) rows
    # logits_ref: (TB, TP) f32   normalized similarities (padded columns hold 0)
    # pred_ref  : (TB, 1)  i32   argmax over the real (unpadded) tool columns
    x = feat_ref[...]
    q = query_ref[...]

    # Raw similarity on the MXU: bf16 operands, f32 accumulate.
    raw = jax.lax.dot_general(
        x, q,
        dimension_numbers=(((1,), (1,)), ((), ())),
        preferred_element_type=jnp.float32,
    )  # (TB, TP)

    # Row-wise inverse L2 norm (EUP rsqrt), applied to the matmul output.
    # Matches `x / x.norm(dim=1, keepdim=True)` of the PyTorch source.
    xf = x.astype(jnp.float32)
    inv_norm = jax.lax.rsqrt(jnp.sum(xf * xf, axis=-1, keepdims=True))  # (TB, 1)
    logits_ref[...] = raw * inv_norm

    # Argmax over the real tool columns (first occurrence on ties, like torch.argmax),
    # computed on the raw (scale-free) scores.  Padded columns masked to -inf.
    col = jax.lax.broadcasted_iota(jnp.int32, raw.shape, 1)
    masked = jnp.where(col < num_tools, raw, -jnp.inf)
    max_val = jnp.max(masked, axis=-1, keepdims=True)
    pred = jnp.min(
        jnp.where(masked == max_val, col, jnp.int32(raw.shape[-1])),
        axis=-1, keepdims=True,
    )
    pred_ref[...] = pred.astype(jnp.int32)


def classify(img_features, query, *, tile_b=512):
    """img_features: (B, D) float; query: (T, D) float with L2-normalized rows.

    Returns (logits: (B, T) float32, pred: (B,) int32).
    """
    B, D = img_features.shape
    T, Dq = query.shape
    assert D == Dq

    # Lane-dense logits output: pad the tool axis up to a multiple of 128.
    TP = max(128, ((T + 127) // 128) * 128)
    # Batch tile: multiple of 16 (bf16 sublane packing); pad B up to a tile multiple.
    TB = min(tile_b, max(16, ((B + 15) // 16) * 16))
    TB = max(16, (TB // 16) * 16)
    B_pad = ((B + TB - 1) // TB) * TB
    grid = (B_pad // TB,)

    # bf16 operands for the MXU; f32 accumulation happens in-kernel.
    feat = jnp.zeros((B_pad, D), dtype=jnp.bfloat16).at[:B].set(
        img_features.astype(jnp.bfloat16))
    q_pad = jnp.zeros((TP, D), dtype=jnp.bfloat16).at[:T].set(
        query.astype(jnp.bfloat16))

    cost = pl.CostEstimate(
        flops=2 * B_pad * D * TP + 3 * B_pad * D,
        transcendentals=B_pad,
        bytes_accessed=B_pad * D * 2 + TP * D * 2 + B_pad * TP * 4 + B_pad * 4,
    )

    logits_pad, pred_pad = pl.pallas_call(
        functools.partial(_classifier_kernel, num_tools=T),
        out_shape=(
            jax.ShapeDtypeStruct((B_pad, TP), jnp.float32),
            jax.ShapeDtypeStruct((B_pad, 1), jnp.int32),
        ),
        grid=grid,
        in_specs=[
            pl.BlockSpec((TB, D), lambda i: (i, 0)),   # batch-tiled features
            pl.BlockSpec((TP, D), lambda i: (0, 0)),   # query block stays resident
        ],
        out_specs=(
            pl.BlockSpec((TB, TP), lambda i: (i, 0)),  # 128-wide lane-dense logits
            pl.BlockSpec((TB, 1), lambda i: (i, 0)),   # per-row class index
        ),
        compiler_params=pltpu.CompilerParams(
            dimension_semantics=("parallel",),
            vmem_limit_bytes=64 * 1024 * 1024,
        ),
        cost_estimate=cost,
    )(feat, q_pad)

    return logits_pad[:B, :T], pred_pad[:B, 0]


if __name__ == "__main__":
    # Small, CLIP-like shapes: embed_dim=512 (ViT-B/32), 7 tools, batch 40.
    # (B and T intentionally not tile-aligned to exercise the padding paths.)
    B, D, T = 40, 512, 7
    key = jax.random.PRNGKey(0)
    k_feat, k_query = jax.random.split(key)

    # Synthetic "encoder output" features (see TODO above).
    img_features = jax.random.normal(k_feat, (B, D), dtype=jnp.float32)

    # Synthetic "query" parameters, L2-normalized as in get_query().
    query_raw = jax.random.normal(k_query, (T, D), dtype=jnp.float32)
    query = query_raw / jnp.linalg.norm(query_raw, axis=-1, keepdims=True)
    tools = [f"tool_{i}" for i in range(T)]

    logits, pred = classify(img_features, query)
    jax.block_until_ready((logits, pred))

    # Pure-JAX / numpy reference of the same semantics (f32 math).
    feat_n = img_features / jnp.linalg.norm(img_features, axis=1, keepdims=True)
    ref_logits = np.asarray(feat_n @ query.T)
    logits_np = np.asarray(logits)
    pred_np = np.asarray(pred)

    # bf16 MXU operands -> ~1e-3-level logit differences vs. the f32 reference.
    assert np.allclose(logits_np, ref_logits, atol=1.5e-2), \
        float(np.max(np.abs(logits_np - ref_logits)))
    # Predictions are valid tool indices (padded columns correctly masked out).
    assert pred_np.shape == (B,) and np.all((pred_np >= 0) & (pred_np < T))
    # Where the f32 reference has a clear top-1 margin, the prediction must agree.
    srt = np.sort(ref_logits, axis=-1)
    clear = (srt[:, -1] - srt[:, -2]) > 2e-2
    ref_pred = np.argmax(ref_logits, axis=-1)
    assert np.array_equal(pred_np[clear], ref_pred[clear])

    _ = [tools[int(i)] for i in pred_np]  # mirrors `pred = [self.tools[i] ...]`
    print("KERNEL_OK")
</pallas_src>

<mosaic_0001>
module attributes {stable_mosaic.version = 11 : i64} {
  func.func @_classifier_kernel(%arg0: i32, %arg1: memref<48x512xbf16, #tpu.memory_space<vmem>>, %arg2: memref<128x512xbf16, #tpu.memory_space<vmem>>, %arg3: memref<48x128xf32, #tpu.memory_space<vmem>>, %arg4: memref<48x1xi32, #tpu.memory_space<vmem>>) attributes {dimension_semantics = [#tpu.dimension_semantics<parallel>], iteration_bounds = array<i64: 1>, scalar_prefetch = 0 : i64, scratch_operands = 0 : i64, tpu.core_type = #tpu.core_type<tc>, window_params = [{transform_indices = @transform_0, window_bounds = array<i64: 48, 512>}, {pipeline_mode = #tpu.pipeline_mode<synchronous>, transform_indices = @transform_1, window_bounds = array<i64: 128, 512>}, {transform_indices = @transform_2, window_bounds = array<i64: 48, 128>}, {transform_indices = @transform_3, window_bounds = array<i64: 48, 1>}]} {
    %c0 = arith.constant 0 : index
    %c0_0 = arith.constant 0 : index
    %0 = vector.load %arg1[%c0, %c0_0] : memref<48x512xbf16, #tpu.memory_space<vmem>>, vector<48x512xbf16>
    %c0_1 = arith.constant 0 : index
    %c0_2 = arith.constant 0 : index
    %1 = vector.load %arg2[%c0_1, %c0_2] : memref<128x512xbf16, #tpu.memory_space<vmem>>, vector<128x512xbf16>
    %cst = arith.constant dense<0.000000e+00> : vector<48x128xf32>
    %2 = tpu.matmul %0, %1, %cst {dimension_numbers = #tpu.dot_dimension_numbers<[1], [1], [0], [0], [0, 0, 1, 0], [], []>} : vector<48x512xbf16>, vector<128x512xbf16>, vector<48x128xf32> -> vector<48x128xf32>
    %3 = arith.extf %0 : vector<48x512xbf16> to vector<48x512xf32>
    %4 = arith.mulf %3, %3 : vector<48x512xf32>
    %cst_3 = arith.constant dense<0.000000e+00> : vector<48xf32>
    %5 = vector.multi_reduction <add>, %4, %cst_3 [1] : vector<48x512xf32> to vector<48xf32>
    %6 = vector.shape_cast %5 : vector<48xf32> to vector<48x1xf32>
    %7 = math.rsqrt %6 : vector<48x1xf32>
    %8 = vector.broadcast %7 : vector<48x1xf32> to vector<48x128xf32>
    %9 = arith.mulf %2, %8 : vector<48x128xf32>
    %c0_4 = arith.constant 0 : index
    %c0_5 = arith.constant 0 : index
    %10 = vector.load %arg3[%c0_4, %c0_5] : memref<48x128xf32, #tpu.memory_space<vmem>>, vector<48x128xf32>
    tpu.vector_store %arg3[%c0_4, %c0_5], %9 {strides = array<i32>} : memref<48x128xf32, #tpu.memory_space<vmem>>, vector<48x128xf32>,
    %11 = tpu.iota {dimensions = array<i32: 1>} : vector<48x128xi32>
    %c7_i32 = arith.constant 7 : i32
    %12 = vector.broadcast %c7_i32 : i32 to vector<48x128xi32>
    %13 = arith.cmpi slt, %11, %12 : vector<48x128xi32>
    %cst_6 = arith.constant 0xFF800000 : f32
    %14 = vector.broadcast %cst_6 : f32 to vector<48x128xf32>
    %15 = arith.select %13, %2, %14 : vector<48x128xi1>, vector<48x128xf32>
    %cst_7 = arith.constant dense<0xFF800000> : vector<48xf32>
    %16 = vector.multi_reduction <maximumf>, %15, %cst_7 [1] : vector<48x128xf32> to vector<48xf32>
    %17 = vector.shape_cast %16 : vector<48xf32> to vector<48x1xf32>
    %18 = vector.broadcast %17 : vector<48x1xf32> to vector<48x128xf32>
    %19 = arith.cmpf oeq, %15, %18 : vector<48x128xf32>
    %c128_i32 = arith.constant 128 : i32
    %20 = vector.broadcast %c128_i32 : i32 to vector<48x128xi32>
    %21 = arith.select %19, %11, %20 : vector<48x128xi1>, vector<48x128xi32>
    %cst_8 = arith.constant dense<2147483647> : vector<48xi32>
    %22 = vector.multi_reduction <minsi>, %21, %cst_8 [1] : vector<48x128xi32> to vector<48xi32>
    %23 = vector.shape_cast %22 : vector<48xi32> to vector<48x1xi32>
    %c0_9 = arith.constant 0 : index
    %c0_10 = arith.constant 0 : index
    %24 = vector.load %arg4[%c0_9, %c0_10] : memref<48x1xi32, #tpu.memory_space<vmem>>, vector<48x1xi32>
    tpu.vector_store %arg4[%c0_9, %c0_10], %23 {strides = array<i32>} : memref<48x1xi32, #tpu.memory_space<vmem>>, vector<48x1xi32>,
    return
  }
  func.func @transform_0(%arg0: i32) -> (i32, i32) {
    %c0_i32 = arith.constant 0 : i32
    %c0_i32_0 = arith.constant 0 : i32
    return %arg0, %c0_i32 : i32, i32
  }
  func.func @transform_1(%arg0: i32) -> (i32, i32) {
    %c0_i32 = arith.constant 0 : i32
    %c0_i32_0 = arith.constant 0 : i32
    %c0_i32_1 = arith.constant 0 : i32
    return %c0_i32, %c0_i32_0 : i32, i32
  }
  func.func @transform_2(%arg0: i32) -> (i32, i32) {
    %c0_i32 = arith.constant 0 : i32
    %c0_i32_0 = arith.constant 0 : i32
    return %arg0, %c0_i32 : i32, i32
  }
  func.func @transform_3(%arg0: i32) -> (i32, i32) {
    %c0_i32 = arith.constant 0 : i32
    %c0_i32_0 = arith.constant 0 : i32
    return %arg0, %c0_i32 : i32, i32
  }
}

</mosaic_0001>

<bundles_post_ra>
// kernel: tpu_custom_call.1
= control target key start
LH: loop header
LB: loop body
LE: loop exit
PB: predicated region body
PF: predicated region fallthrough
CT: control target
= control target key end

     0   :  { %9 = vsyncpa [#allocation3], 0  ;;  %s1206_s0 = inlined_call_operand.hbm [shape: bf16[48,512], index: 0, kind: input, shape index: {}]   ;;  %s1207_s1 = inlined_call_operand.hbm [shape: bf16[128,512], index: 1, kind: input, shape index: {}]   ;;  %s1208_s2 = inlined_call_operand.hbm [shape: f32[48,128], index: 2, kind: output, shape index: {0}]   ;;  %s1209_s3 = inlined_call_operand.vmem [shape: s32[48,1], index: 3, kind: output, shape index: {1}]  }
   0x1   :  { %10 = vsyncpa [#allocation6], 0 }
   0x2   :  { %11 = vsyncpa [#allocation4], 0  ;;  %s16_s14 = sshll.u32 %s1206_s0, 4  ;;  %s1021_s15 = smov [#allocation2]   ;;  %s17_s14 = int_to_ptr.hbm [resolvable:$true] %s16_s14 }
   0x3   :  { %s18_s16 = sshll.u32 %s1021_s15, 4  ;;  %s29_s19 = sshll.u32 %s1207_s1, 4  ;;  %s19_s16 = int_to_ptr.vmem [resolvable:$true] %s18_s16  ;;  %s30_s19 = int_to_ptr.hbm [resolvable:$true] %s29_s19 }
   0x4   :  { %s1022_s20 = smov 256   ;;  %s1023_s21 = smov 16  }
   0x5   :  { %24 = dma.hbm_to_vmem [thread:$0]  %s17_s14, 1536, %s19_s16, [#allocation3], %s1022_s20, %s1022_s20, %s1023_s21  }
   0x6   :  { %s1024_s22 = smov [#allocation5]  }
   0x7   :  { %s31_s23 = sshll.u32 %s1024_s22, 4  ;;  %s32_s23 = int_to_ptr.vmem [resolvable:$true] %s31_s23 }
   0x8   :  { %37 = dma.hbm_to_vmem [thread:$0]  %s30_s19, 4096, %s32_s23, [#allocation6], %s1022_s20, %s1022_s20, %s1023_s21  }
   0x9   :  { %1015 = dma.done.wait [#allocation3], 1536  }
   0xa   :  { %1016 = vsyncadd [#allocation3], 4294965760 }
   0xb   :  { %1017 = dma.done.wait [#allocation6], 4096  }
   0xc   :  { %1018 = vsyncadd [#allocation6], 4294963200  ;;  %v866_v0 = vld [vmem:[#allocation5 + $0xe0] sm:$0xf]  ;;  %v922_v1 = vld [vmem:[#allocation5 + $0xec] sm:$0xf0] }
   0xd   :  { %v920_v2 = vld [vmem:[#allocation5 + $0xe4] sm:$0xf]  ;;  %v867_v3 = vor.u32 %v922_v1, %v866_v0  ;;  %v868_v4 = vld [vmem:[#allocation5 + $0xf0] sm:$0xf0]  ;;  %v874_v5 = vld [vmem:[#allocation5 + $0xe8] sm:$0xf] }
   0xe   :  { %v923_v6 = vld [vmem:[#allocation5 + $0xf4] sm:$0xf0]  ;;  %v871_v7 = vor.u32 %v920_v2, %v868_v4  ;;  %v921_v9 = vld [vmem:[#allocation5 + $0xec] sm:$0xf]  ;;  %v876_v10 = vld [vmem:[#allocation5 + $0xf8] sm:$0xf0] }
   0xf   :  { %v875_v8 = vor.u32 %v923_v6, %v874_v5  ;;  %310 = vmatpush.bf16.xpose.msra.mxu0 %v867_v3  ;;  %v879_v11 = vor.u32 %v921_v9, %v876_v10  ;;  %v850_v12 = vld [vmem:[#allocation5 + $0xc0] sm:$0xf]  ;;  %v918_v13 = vld [vmem:[#allocation5 + $0xcc] sm:$0xf0]  ;;  %v916_v14 = vld [vmem:[#allocation5 + $0xc4] sm:$0xf] }
  0x10   :  { %334 = vmatpush.bf16.xpose.msra.mxu1 %v871_v7  ;;  %v852_v15 = vld [vmem:[#allocation5 + $0xd0] sm:$0xf0]  ;;  %v858_v16 = vld [vmem:[#allocation5 + $0xc8] sm:$0xf]  ;;  %v919_v17 = vld [vmem:[#allocation5 + $0xd4] sm:$0xf0]  ;;  %v851_v20 = vor.u32 %v918_v13, %v850_v12 }
  0x11   :  { %358 = vmatpush.bf16.xpose.msra.mxu2 %v875_v8  ;;  %382 = vmatpush.bf16.xpose.msra.mxu3 %v879_v11  ;;  %v917_v18 = vld [vmem:[#allocation5 + $0xcc] sm:$0xf]  ;;  %v860_v19 = vld [vmem:[#allocation5 + $0xd8] sm:$0xf0]  ;;  %v855_v21 = vor.u32 %v916_v14, %v852_v15  ;;  %v859_v22 = vor.u32 %v919_v17, %v858_v16  ;;  %v834_v24 = vld [vmem:[#allocation5 + $0xa0] sm:$0xf] }
  0x12   :  { %v863_v23 = vor.u32 %v917_v18, %v860_v19  ;;  %v914_v25 = vld [vmem:[#allocation5 + $0xac] sm:$0xf0]  ;;  %v912_v26 = vld [vmem:[#allocation5 + $0xa4] sm:$0xf]  ;;  %v836_v27 = vld [vmem:[#allocation5 + $0xb0] sm:$0xf0] }
  0x13   :  { %v842_v28 = vld [vmem:[#allocation5 + $0xa8] sm:$0xf]  ;;  %v915_v29 = vld [vmem:[#allocation5 + $0xb4] sm:$0xf0]  ;;  %v913_v30 = vld [vmem:[#allocation5 + $0xac] sm:$0xf]  ;;  %v835_v32 = vor.u32 %v914_v25, %v834_v24  ;;  %v839_v33 = vor.u32 %v912_v26, %v836_v27 }
  0x14   :  { %v844_v31 = vld [vmem:[#allocation5 + $0xb8] sm:$0xf0]  ;;  %v843_v34 = vor.u32 %v915_v29, %v842_v28  ;;  %v818_v36 = vld [vmem:[#allocation5 + $0x80] sm:$0xf]  ;;  %v910_v37 = vld [vmem:[#allocation5 + $0x8c] sm:$0xf0] }
  0x15   :  { %v847_v35 = vor.u32 %v913_v30, %v844_v31  ;;  %v908_v38 = vld [vmem:[#allocation5 + $0x84] sm:$0xf]  ;;  %v820_v39 = vld [vmem:[#allocation5 + $0x90] sm:$0xf0]  ;;  %v826_v40 = vld [vmem:[#allocation5 + $0x88] sm:$0xf]  ;;  %v819_v44 = vor.u32 %v910_v37, %v818_v36 }
  0x16   :  { %v911_v41 = vld [vmem:[#allocation5 + $0x94] sm:$0xf0]  ;;  %v909_v42 = vld [vmem:[#allocation5 + $0x8c] sm:$0xf]  ;;  %v828_v43 = vld [vmem:[#allocation5 + $0x98] sm:$0xf0]  ;;  %v823_v45 = vor.u32 %v908_v38, %v820_v39 }
  0x17   :  { %311 = vmatpush.bf16.xpose.msra.mxu0 %v851_v20  ;;  %v827_v46 = vor.u32 %v911_v41, %v826_v40  ;;  %v831_v47 = vor.u32 %v909_v42, %v828_v43  ;;  %v802_v48 = vld [vmem:[#allocation5 + $0x60] sm:$0xf]  ;;  %v906_v49 = vld [vmem:[#allocation5 + $0x6c] sm:$0xf0]  ;;  %v904_v50 = vld [vmem:[#allocation5 + $0x64] sm:$0xf] }
  0x18   :  { %335 = vmatpush.bf16.xpose.msra.mxu1 %v855_v21  ;;  %v804_v51 = vld [vmem:[#allocation5 + $0x70] sm:$0xf0]  ;;  %v810_v52 = vld [vmem:[#allocation5 + $0x68] sm:$0xf]  ;;  %v907_v53 = vld [vmem:[#allocation5 + $0x74] sm:$0xf0]  ;;  %v803_v56 = vor.u32 %v906_v49, %v802_v48 }
  0x19   :  { %359 = vmatpush.bf16.xpose.msra.mxu2 %v859_v22  ;;  %383 = vmatpush.bf16.xpose.msra.mxu3 %v863_v23  ;;  %v905_v54 = vld [vmem:[#allocation5 + $0x6c] sm:$0xf]  ;;  %v812_v55 = vld [vmem:[#allocation5 + $0x78] sm:$0xf0]  ;;  %v807_v57 = vor.u32 %v904_v50, %v804_v51  ;;  %v811_v58 = vor.u32 %v907_v53, %v810_v52  ;;  %v786_v60 = vld [vmem:[#allocation5 + $0x40] sm:$0xf] }
  0x1a   :  { %v815_v59 = vor.u32 %v905_v54, %v812_v55  ;;  %v902_v61 = vld [vmem:[#allocation5 + $0x4c] sm:$0xf0]  ;;  %v900_v62 = vld [vmem:[#allocation5 + $0x44] sm:$0xf]  ;;  %v788_v63 = vld [vmem:[#allocation5 + $0x50] sm:$0xf0] }
  0x1b   :  { %v794_v0 = vld [vmem:[#allocation5 + $0x48] sm:$0xf]  ;;  %v903_v1 = vld [vmem:[#allocation5 + $0x54] sm:$0xf0]  ;;  %v901_v2 = vld [vmem:[#allocation5 + $0x4c] sm:$0xf]  ;;  %v787_v4 = vor.u32 %v902_v61, %v786_v60  ;;  %v791_v5 = vor.u32 %v900_v62, %v788_v63 }
  0x1c   :  { %v796_v3 = vld [vmem:[#allocation5 + $0x58] sm:$0xf0]  ;;  %v795_v6 = vor.u32 %v903_v1, %v794_v0  ;;  %v770_v8 = vld [vmem:[#allocation5 + $0x20] sm:$0xf]  ;;  %v898_v9 = vld [vmem:[#allocation5 + $0x2c] sm:$0xf0] }
  0x1d   :  { %v799_v7 = vor.u32 %v901_v2, %v796_v3  ;;  %v896_v10 = vld [vmem:[#allocation5 + $0x24] sm:$0xf]  ;;  %v772_v11 = vld [vmem:[#allocation5 + $0x30] sm:$0xf0]  ;;  %v778_v12 = vld [vmem:[#allocation5 + $0x28] sm:$0xf]  ;;  %v771_v16 = vor.u32 %v898_v9, %v770_v8 }
  0x1e   :  { %v899_v13 = vld [vmem:[#allocation5 + $0x34] sm:$0xf0]  ;;  %v897_v14 = vld [vmem:[#allocation5 + $0x2c] sm:$0xf]  ;;  %v780_v15 = vld [vmem:[#allocation5 + $0x38] sm:$0xf0]  ;;  %v775_v17 = vor.u32 %v896_v10, %v772_v11 }
  0x1f   :  { %312 = vmatpush.bf16.xpose.msra.mxu0 %v835_v32  ;;  %v779_v18 = vor.u32 %v899_v13, %v778_v12  ;;  %v783_v19 = vor.u32 %v897_v14, %v780_v15  ;;  %v754_v20 = vld [vmem:[#allocation5] sm:$0xf]  ;;  %v894_v21 = vld [vmem:[#allocation5 + $0xc] sm:$0xf0]  ;;  %v892_v22 = vld [vmem:[#allocation5 + $0x4] sm:$0xf] }
  0x20   :  { %336 = vmatpush.bf16.xpose.msra.mxu1 %v839_v33  ;;  %v756_v23 = vld [vmem:[#allocation5 + $0x10] sm:$0xf0]  ;;  %v762_v24 = vld [vmem:[#allocation5 + $0x8] sm:$0xf]  ;;  %v895_v25 = vld [vmem:[#allocation5 + $0x14] sm:$0xf0]  ;;  %v755_v28 = vor.u32 %v894_v21, %v754_v20 }
  0x21   :  { %360 = vmatpush.bf16.xpose.msra.mxu2 %v843_v34  ;;  %384 = vmatpush.bf16.xpose.msra.mxu3 %v847_v35  ;;  %v893_v26 = vld [vmem:[#allocation5 + $0xc] sm:$0xf]  ;;  %v764_v27 = vld [vmem:[#allocation5 + $0x18] sm:$0xf0]  ;;  %v759_v29 = vor.u32 %v892_v22, %v756_v23  ;;  %v763_v30 = vor.u32 %v895_v25, %v762_v24  ;;  %v706_v32 = vld [vmem:[#allocation2] sm:$0xf] }
  0x22   :  { %v767_v31 = vor.u32 %v893_v26, %v764_v27  ;;  %v882_v33 = vld [vmem:[#allocation2 + $0xc] sm:$0xf0]  ;;  %v880_v34 = vld [vmem:[#allocation2 + $0x4] sm:$0xf]  ;;  %v708_v35 = vld [vmem:[#allocation2 + $0x10] sm:$0xf0] }
  0x23   :  { %v714_v36 = vld [vmem:[#allocation2 + $0x8] sm:$0xf]  ;;  %v883_v37 = vld [vmem:[#allocation2 + $0x14] sm:$0xf0]  ;;  %v881_v38 = vld [vmem:[#allocation2 + $0xc] sm:$0xf]  ;;  %v707_v40 = vor.u32 %v882_v33, %v706_v32  ;;  %v711_v41 = vor.u32 %v880_v34, %v708_v35 }
  0x24   :  { %v716_v39 = vld [vmem:[#allocation2 + $0x18] sm:$0xf0]  ;;  %v715_v42 = vor.u32 %v883_v37, %v714_v36  ;;  %v730_v48 = vld [vmem:[#allocation2 + $0x28] sm:$0xf]  ;;  %v887_v49 = vld [vmem:[#allocation2 + $0x34] sm:$0xf0] }
  0x25   :  { %v719_v43 = vor.u32 %v881_v38, %v716_v39  ;;  %v885_v50 = vld [vmem:[#allocation2 + $0x2c] sm:$0xf]  ;;  %v732_v51 = vld [vmem:[#allocation2 + $0x38] sm:$0xf0]  ;;  %v731_v54 = vor.u32 %v887_v49, %v730_v48  ;;  %v746_v60 = vld [vmem:[#allocation2 + $0x48] sm:$0xf] }
  0x26   :  { %v735_v55 = vor.u32 %v885_v50, %v732_v51  ;;  %v891_v61 = vld [vmem:[#allocation2 + $0x54] sm:$0xf0]  ;;  %v889_v62 = vld [vmem:[#allocation2 + $0x4c] sm:$0xf]  ;;  %v748_v63 = vld [vmem:[#allocation2 + $0x58] sm:$0xf0] }
  0x27   :  { %313 = vmatpush.bf16.xpose.msra.mxu0 %v819_v44  ;;  %v722_v44 = vld [vmem:[#allocation2 + $0x20] sm:$0xf]  ;;  %v747_v2 = vor.u32 %v891_v61, %v746_v60  ;;  %v751_v3 = vor.u32 %v889_v62, %v748_v63  ;;  %s1025_s0 = smov [#allocation7]   ;;  %s686_s26 = sshll.u32 %s1208_s2, 4  ;;  %s687_s26 = int_to_ptr.hbm [resolvable:$true] %s686_s26 }
  0x28   :  { %337 = vmatpush.bf16.xpose.msra.mxu1 %v823_v45  ;;  %v886_v45 = vld [vmem:[#allocation2 + $0x2c] sm:$0xf0]  ;;  %v46_v63 = vld [vmem:[#allocation2] sm:$0xff]  ;;  %s684_s1 = sshll.u32 %s1025_s0, 4  ;;  %s1026_s27 = smov 128   ;;  %s685_s1 = int_to_ptr.vmem [resolvable:$true] %s684_s1 }
  0x29   :  { %361 = vmatpush.bf16.xpose.msra.mxu2 %v827_v46  ;;  %385 = vmatpush.bf16.xpose.msra.mxu3 %v831_v47  ;;  %v884_v46 = vld [vmem:[#allocation2 + $0x24] sm:$0xf]  ;;  %v724_v47 = vld [vmem:[#allocation2 + $0x30] sm:$0xf0]  ;;  %v723_v52 = vor.u32 %v886_v45, %v722_v44  ;;  %s1027_s28 = smov 8  }
  0x2a   :  { %v727_v53 = vor.u32 %v884_v46, %v724_v47 }
  0x2f   :  { %314 = vmatpush.bf16.xpose.msra.mxu0 %v803_v56  ;;  %v738_v56 = vld [vmem:[#allocation2 + $0x40] sm:$0xf] }
  0x30   :  { %338 = vmatpush.bf16.xpose.msra.mxu1 %v807_v57  ;;  %v890_v57 = vld [vmem:[#allocation2 + $0x4c] sm:$0xf0] }
  0x31   :  { %362 = vmatpush.bf16.xpose.msra.mxu2 %v811_v58  ;;  %386 = vmatpush.bf16.xpose.msra.mxu3 %v815_v59  ;;  %v888_v58 = vld [vmem:[#allocation2 + $0x44] sm:$0xf]  ;;  %v740_v59 = vld [vmem:[#allocation2 + $0x50] sm:$0xf0]  ;;  %v739_v0 = vor.u32 %v890_v57, %v738_v56 }
  0x32   :  { %v743_v1 = vor.u32 %v888_v58, %v740_v59 }
  0x37   :  { %315 = vmatpush.bf16.xpose.msra.mxu0 %v787_v4 }
  0x38   :  { %339 = vmatpush.bf16.xpose.msra.mxu1 %v791_v5 }
  0x39   :  { %363 = vmatpush.bf16.xpose.msra.mxu2 %v795_v6  ;;  %387 = vmatpush.bf16.xpose.msra.mxu3 %v799_v7  ;;  %v556_v6 = vlaneseq }
  0x3b   :  { %v1054_v8 = vand.u32 127, %v556_v6  ;;  %v48_v6 = vld [vmem:[#allocation2 + $0x10] sm:$0xff] }
  0x3d   :  { %vm558_vm0 = vcmp.lt.s32.totalorder %v1054_v8, 7 }
  0x3f   :  { %316 = vmatpush.bf16.xpose.msra.mxu0 %v771_v16 }
  0x40   :  { %340 = vmatpush.bf16.xpose.msra.mxu1 %v775_v17 }
  0x41   :  { %364 = vmatpush.bf16.xpose.msra.mxu2 %v779_v18  ;;  %388 = vmatpush.bf16.xpose.msra.mxu3 %v783_v19 }
  0x47   :  { %317 = vmatpush.bf16.xpose.msra.mxu0 %v755_v28 }
  0x48   :  { %341 = vmatpush.bf16.xpose.msra.mxu1 %v759_v29 }
  0x49   :  { %365 = vmatpush.bf16.xpose.msra.mxu2 %v763_v30  ;;  %389 = vmatpush.bf16.xpose.msra.mxu3 %v767_v31 }
  0x4e   :  { %318 = vmatmul.bf16.vlgmr.msra.gmra.mxu0 %v707_v40 }
  0x4f   :  { %342 = vmatmul.bf16.vlgmr.msra.gmra.mxu1 %v711_v41 }
  0x50   :  { %366 = vmatmul.bf16.vlgmr.msra.gmra.mxu2 %v715_v42  ;;  %390 = vmatmul.bf16.vlgmr.msra.gmra.mxu3 %v719_v43 }
  0x5e   :  { %323 = vmatmul.bf16.gmra.mxu0 %v723_v52 }
  0x5f   :  { %347 = vmatmul.bf16.gmra.mxu1 %v727_v53 }
  0x60   :  { %371 = vmatmul.bf16.gmra.mxu2 %v731_v54  ;;  %395 = vmatmul.bf16.gmra.mxu3 %v735_v55 }
  0x6e   :  { %328 = vmatmul.bf16.gmra.mxu0 %v739_v0 }
  0x6f   :  { %352 = vmatmul.bf16.gmra.mxu1 %v743_v1 }
  0x70   :  { %376 = vmatmul.bf16.gmra.mxu2 %v747_v2  ;;  %400 = vmatmul.bf16.gmra.mxu3 %v751_v3  ;;  %v406_v2 = vunpack.c.l.bf16 %v46_v63  ;;  %v407_v3 = vunpack.c.h.bf16 %v46_v63 }
  0xcb   :  { %v319_v4 = vpop.f32.mrf.mxu0 }
  0xcc   :  { %v343_v5 = vpop.f32.mrf.mxu1 }
  0xcd   :  { %v344_v7 = vadd.f32 %v343_v5, %v319_v4  ;;  %v47_v4 = vld [vmem:[#allocation2 + $0x8] sm:$0xff] }
  0xd3   :  { %v367_v9 = vpop.f32.mrf.mxu2  ;;  %v391_v11 = vpop.f32.mrf.mxu3 }
  0xd4   :  { %v368_v10 = vadd.f32 %v367_v9, %v344_v7  ;;  %v321_v12 = vpop.f32.mrf.mxu0  ;;  %v345_v13 = vpop.f32.mrf.mxu1  ;;  %v408_v7 = vunpack.c.l.bf16 %v47_v4  ;;  %v430_v9 = vmul.f32 %v406_v2, %v406_v2 }
  0xd5   :  { %v346_v16 = vadd.f32 %v345_v13, %v321_v12  ;;  %v410_v12 = vunpack.c.l.bf16 %v48_v6  ;;  %v411_v13 = vunpack.c.h.bf16 %v48_v6 }
  0xd6   :  { %v1057_v14 = vadd.f32 %v391_v11, %v368_v10  ;;  %v431_v10 = vmul.f32 %v407_v3, %v407_v3 }
  0xd8   :  { %v559_v15 = vsel %vm558_vm0, %v1057_v14, -inf }
  0xd9   :  { %565 = vmax.xlane.f32.xlu0 %v559_v15 }
  0xdb   :  { %v369_v17 = vpop.f32.mrf.mxu2  ;;  %v393_v19 = vpop.f32.mrf.mxu3 }
  0xdc   :  { %v370_v18 = vadd.f32 %v369_v17, %v346_v16  ;;  %v324_v20 = vpop.f32.mrf.mxu0  ;;  %v348_v21 = vpop.f32.mrf.mxu1  ;;  %v49_v17 = vld [vmem:[#allocation2 + $0x18] sm:$0xff] }
  0xdd   :  { %v349_v23 = vadd.f32 %v348_v21, %v324_v20  ;;  %v432_v20 = vmul.f32 %v408_v7, %v408_v7  ;;  %v454_v21 = vadd.f32 %v431_v10, %v430_v9 }
  0xde   :  { %v1062_v22 = vadd.f32 %v393_v19, %v370_v18  ;;  %v409_v19 = vunpack.c.h.bf16 %v47_v4 }
  0xe0   :  { %v560_v24 = vsel %vm558_vm0, %v1062_v22, -inf }
  0xe1   :  { %567 = vmax.xlane.f32.xlu0 %v560_v24 }
  0xe3   :  { %v372_v25 = vpop.f32.mrf.mxu2  ;;  %v396_v27 = vpop.f32.mrf.mxu3 }
  0xe4   :  { %v373_v26 = vadd.f32 %v372_v25, %v349_v23  ;;  %v326_v28 = vpop.f32.mrf.mxu0  ;;  %v350_v29 = vpop.f32.mrf.mxu1 }
  0xe5   :  { %v351_v32 = vadd.f32 %v350_v29, %v326_v28  ;;  %v435_v28 = vmul.f32 %v411_v13, %v411_v13  ;;  %v53_v29 = vld [vmem:[#allocation2 + $0x38] sm:$0xff]  ;;  %v56_v13 = vld [vmem:[#allocation2 + $0x50] sm:$0xff] }
  0xe6   :  { %v1067_v30 = vadd.f32 %v396_v27, %v373_v26  ;;  %v412_v26 = vunpack.c.l.bf16 %v49_v17  ;;  %v434_v27 = vmul.f32 %v410_v12, %v410_v12 }
  0xe8   :  { %v561_v31 = vsel %vm558_vm0, %v1067_v30, -inf }
  0xe9   :  { %569 = vmax.xlane.f32.xlu1 %v561_v31 }
  0xeb   :  { %v374_v33 = vpop.f32.mrf.mxu2  ;;  %v398_v35 = vpop.f32.mrf.mxu3 }
  0xec   :  { %v375_v34 = vadd.f32 %v374_v33, %v351_v32  ;;  %v329_v36 = vpop.f32.mrf.mxu0  ;;  %v353_v37 = vpop.f32.mrf.mxu1  ;;  %v455_v32 = vadd.f32 %v454_v21, %v432_v20  ;;  %v50_v33 = vld [vmem:[#allocation2 + $0x20] sm:$0xff] }
  0xed   :  { %v354_v39 = vadd.f32 %v353_v37, %v329_v36 }
  0xee   :  { %v1072_v38 = vadd.f32 %v398_v35, %v375_v34  ;;  %v420_v35 = vunpack.c.l.bf16 %v53_v29 }
  0xf0   :  { %v562_v40 = vsel %vm558_vm0, %v1072_v38, -inf }
  0xf1   :  { %571 = vmax.xlane.f32.xlu1 %v562_v40 }
  0xf3   :  { %v377_v41 = vpop.f32.mrf.mxu2  ;;  %v401_v43 = vpop.f32.mrf.mxu3 }
  0xf4   :  { %v378_v42 = vadd.f32 %v377_v41, %v354_v39  ;;  %v331_v45 = vpop.f32.mrf.mxu0  ;;  %v355_v46 = vpop.f32.mrf.mxu1  ;;  %v54_v39 = vld [vmem:[#allocation2 + $0x40] sm:$0xff]  ;;  %v436_v41 = vmul.f32 %v412_v26, %v412_v26 }
  0xf5   :  { %v356_v48 = vadd.f32 %v355_v46, %v331_v45  ;;  %v51_v45 = vld [vmem:[#allocation2 + $0x28] sm:$0xff]  ;;  %v414_v46 = vunpack.c.l.bf16 %v50_v33 }
  0xf6   :  { %v1077_v44 = vadd.f32 %v401_v43, %v378_v42  ;;  %v459_v42 = vadd.f32 %v435_v28, %v434_v27  ;;  %v416_v2 = vunpack.c.l.bf16 %v51_v45  ;;  %v426_v27 = vunpack.c.l.bf16 %v56_v13 }
  0xf7   :  { %v438_v3 = vmul.f32 %v414_v46, %v414_v46  ;;  %v427_v28 = vunpack.c.h.bf16 %v56_v13 }
  0xf8   :  { %v1082_v47 = vsel %vm558_vm0, %v1077_v44, -inf }
  0xf9   :  { %573 = vmax.xlane.f32.xlu2 %v1082_v47 }
  0xfb   :  { %v379_v49 = vpop.f32.mrf.mxu2  ;;  %v403_v51 = vpop.f32.mrf.mxu3 }
  0xfc   :  { %v380_v50 = vadd.f32 %v379_v49, %v356_v48  ;;  %v415_v48 = vunpack.c.h.bf16 %v50_v33 }
  0xfe   :  { %v1085_v52 = vadd.f32 %v403_v51, %v380_v50  ;;  %v55_v51 = vld [vmem:[#allocation2 + $0x48] sm:$0xff]  ;;  %v439_v4 = vmul.f32 %v415_v48, %v415_v48 }
  0xff   :  { %v424_v6 = vunpack.c.l.bf16 %v55_v51  ;;  %v425_v21 = vunpack.c.h.bf16 %v55_v51 }
 0x100   :  { %v1090_v53 = vsel %vm558_vm0, %v1085_v52, -inf  ;;  %v464_v20 = vadd.f32 %v439_v4, %v438_v3 }
 0x101   :  { %575 = vmax.xlane.f32.xlu2 %v1090_v53 }
 0x14c   :  { %v566_v54 = vpop.xlane.xlu0 %565 }
 0x14d   :  { %vm577_vm1 = vcmp.eq.f32.partialorder %v559_v15, %v566_v54  ;;  %v52_v15 = vld [vmem:[#allocation2 + $0x30] sm:$0xff]  ;;  %v422_v54 = vunpack.c.l.bf16 %v54_v39 }
 0x14e   :  { %v1094_v55 = vsel %vm577_vm1, %v1054_v8, 128  ;;  %v418_v23 = vunpack.c.l.bf16 %v52_v15 }
 0x14f   :  { %v590_v56 = vshra.s32 %v1094_v55, 16  ;;  %v446_v7 = vmul.f32 %v422_v54, %v422_v54 }
 0x150   :  { %v442_v36 = vmul.f32 %v418_v23, %v418_v23  ;;  %v448_v23 = vmul.f32 %v424_v6, %v424_v6 }
 0x151   :  { %v1097_v57 = vcvt.s32.f32 %v590_v56  ;;  %v423_v56 = vunpack.c.h.bf16 %v54_v39 }
 0x153   :  { %593 = vmin.xlane.f32.xlu0 %v1097_v57  ;;  %v447_v9 = vmul.f32 %v423_v56, %v423_v56 }
 0x154   :  { %v568_v58 = vpop.xlane.xlu0 %567 }
 0x155   :  { %vm578_vm2 = vcmp.eq.f32.partialorder %v560_v24, %v568_v58  ;;  %v419_v24 = vunpack.c.h.bf16 %v52_v15  ;;  %v421_v58 = vunpack.c.h.bf16 %v53_v29  ;;  %v474_v26 = vadd.f32 %v447_v9, %v446_v7 }
 0x156   :  { %v1101_v59 = vsel %vm578_vm2, %v1054_v8, 128 }
 0x157   :  { %v604_v60 = vshra.s32 %v1101_v59, 16  ;;  %v443_v37 = vmul.f32 %v419_v24, %v419_v24 }
 0x159   :  { %v1104_v61 = vcvt.s32.f32 %v604_v60  ;;  %v444_v60 = vmul.f32 %v420_v35, %v420_v35 }
 0x15b   :  { %607 = vmin.xlane.f32.xlu1 %v1104_v61 }
 0x15c   :  { %v570_v62 = vpop.xlane.xlu1 %569 }
 0x15d   :  { %vm579_vm3 = vcmp.eq.f32.partialorder %v561_v31, %v570_v62  ;;  %v433_v31 = vmul.f32 %v409_v19, %v409_v19  ;;  %v469_v62 = vadd.f32 %v443_v37, %v442_v36  ;;  %v450_v36 = vmul.f32 %v426_v27, %v426_v27 }
 0x15e   :  { %v1108_v0 = vsel %vm579_vm3, %v1054_v8, 128  ;;  %v451_v37 = vmul.f32 %v427_v28, %v427_v28 }
 0x15f   :  { %v618_v1 = vshra.s32 %v1108_v0, 16  ;;  %v456_v50 = vadd.f32 %v455_v32, %v433_v31  ;;  %v470_v12 = vadd.f32 %v469_v62, %v444_v60  ;;  %v57_v31 = vld [vmem:[#allocation2 + $0x58] sm:$0xff] }
 0x160   :  { %v428_v35 = vunpack.c.l.bf16 %v57_v31 }
 0x161   :  { %v1111_v5 = vcvt.s32.f32 %v618_v1  ;;  %v460_v1 = vadd.f32 %v459_v42, %v436_v41  ;;  %v429_v41 = vunpack.c.h.bf16 %v57_v31 }
 0x162   :  { %v452_v42 = vmul.f32 %v428_v35, %v428_v35 }
 0x163   :  { %621 = vmin.xlane.f32.xlu2 %v1111_v5  ;;  %v453_v46 = vmul.f32 %v429_v41, %v429_v41 }
 0x164   :  { %v572_v11 = vpop.xlane.xlu1 %571 }
 0x165   :  { %vm580_vm4 = vcmp.eq.f32.partialorder %v562_v40, %v572_v11  ;;  %v413_v40 = vunpack.c.h.bf16 %v49_v17  ;;  %v445_v11 = vmul.f32 %v421_v58, %v421_v58  ;;  %v417_v17 = vunpack.c.h.bf16 %v51_v45 }
 0x166   :  { %v1115_v16 = vsel %vm580_vm4, %v1054_v8, 128  ;;  %v479_v45 = vadd.f32 %v451_v37, %v450_v36  ;;  %v603_v58 = vand.u32 65535, %v1101_v59 }
 0x167   :  { %v632_v18 = vshra.s32 %v1115_v16, 16  ;;  %v471_v29 = vadd.f32 %v470_v12, %v445_v11  ;;  %v441_v33 = vmul.f32 %v417_v17, %v417_v17  ;;  %v631_v59 = vand.u32 65535, %v1115_v16 }
 0x168   :  { %v480_v48 = vadd.f32 %v479_v45, %v452_v42  ;;  %v605_v62 = vcvt.s32.f32 %v603_v58 }
 0x169   :  { %v1118_v25 = vcvt.s32.f32 %v632_v18  ;;  %v440_v18 = vmul.f32 %v416_v2, %v416_v2  ;;  %v633_v4 = vcvt.s32.f32 %v631_v59 }
 0x16b   :  { %635 = vmin.xlane.f32.xlu0 %v1118_v25 }
 0x16c   :  { %v574_v34 = vpop.xlane.xlu2 %573 }
 0x16d   :  { %vm581_vm5 = vcmp.eq.f32.partialorder %v1082_v47, %v574_v34  ;;  %v437_v47 = vmul.f32 %v413_v40, %v413_v40  ;;  %v449_v34 = vmul.f32 %v425_v21, %v425_v21 }
 0x16e   :  { %v1123_v43 = vsel %vm581_vm5, %v1054_v8, 128 }
 0x16f   :  { %v646_v49 = vshra.s32 %v1123_v43, 16  ;;  %v461_v15 = vadd.f32 %v460_v1, %v437_v47 }
 0x171   :  { %v1126_v63 = vcvt.s32.f32 %v646_v49  ;;  %v481_v49 = vadd.f32 %v480_v48, %v453_v46 }
 0x173   :  { %649 = vmin.xlane.f32.xlu1 %v1126_v63  ;;  %457 = vadd.xlane.f32.xlu0 %v456_v50  ;;  %v589_v50 = vand.u32 65535, %v1094_v55  ;;  %v617_v55 = vand.u32 65535, %v1108_v0  ;;  %v645_v0 = vand.u32 65535, %v1123_v43 }
 0x174   :  { %v576_v10 = vpop.xlane.xlu2 %575 }
 0x175   :  { %vm582_vm6 = vcmp.eq.f32.partialorder %v1090_v53, %v576_v10  ;;  %v465_v53 = vadd.f32 %v464_v20, %v440_v18  ;;  %v591_v54 = vcvt.s32.f32 %v589_v50  ;;  %v619_v2 = vcvt.s32.f32 %v617_v55 }
 0x176   :  { %v1131_v19 = vsel %vm582_vm6, %v1054_v8, 128  ;;  %v475_v8 = vadd.f32 %v474_v26, %v448_v23  ;;  %v647_v9 = vcvt.s32.f32 %v645_v0 }
 0x177   :  { %v660_v24 = vshra.s32 %v1131_v19, 16  ;;  %v466_v39 = vadd.f32 %v465_v53, %v441_v33  ;;  %v659_v16 = vand.u32 65535, %v1131_v19 }
 0x178   :  { %v476_v40 = vadd.f32 %v475_v8, %v449_v34 }
 0x179   :  { %v1134_v32 = vcvt.s32.f32 %v660_v24  ;;  %v661_v13 = vcvt.s32.f32 %v659_v16 }
 0x17b   :  { %663 = vmin.xlane.f32.xlu2 %v1134_v32  ;;  %462 = vadd.xlane.f32.xlu1 %v461_v15 }
 0x17c   :  { %472 = vadd.xlane.f32.xlu0 %v471_v29 }
 0x183   :  { %467 = vadd.xlane.f32.xlu2 %v466_v39  ;;  %477 = vadd.xlane.f32.xlu1 %v476_v40 }
 0x18b   :  { %482 = vadd.xlane.f32.xlu2 %v481_v49 }
 0x1c6   :  { %v1138_v51 = vpop.xlane.xlu0 %593 }
 0x1c7   :  { %vm595_vm7 = vcmp.eq.f32.partialorder %v1097_v57, %v1138_v51 }
 0x1c8   :  { %v596_v56 = vsel %vm595_vm7, %v591_v54, inf }
 0x1c9   :  { %597 = vmin.xlane.f32.xlu0 %v596_v56 }
 0x1ce   :  { %v1143_v60 = vpop.xlane.xlu1 %607 }
 0x1cf   :  { %vm609_vm8 = vcmp.eq.f32.partialorder %v1104_v61, %v1143_v60 }
 0x1d0   :  { %v610_v47 = vsel %vm609_vm8, %v605_v62, inf }
 0x1d1   :  { %611 = vmin.xlane.f32.xlu1 %v610_v47 }
 0x1d6   :  { %v1148_v1 = vpop.xlane.xlu2 %621 }
 0x1d7   :  { %vm623_vm9 = vcmp.eq.f32.partialorder %v1111_v5, %v1148_v1 }
 0x1d8   :  { %v624_v57 = vsel %vm623_vm9, %v619_v2, inf }
 0x1d9   :  { %625 = vmin.xlane.f32.xlu2 %v624_v57 }
 0x1de   :  { %v1153_v3 = vpop.xlane.xlu0 %635 }
 0x1df   :  { %vm637_vm10 = vcmp.eq.f32.partialorder %v1118_v25, %v1153_v3 }
 0x1e0   :  { %v638_v61 = vsel %vm637_vm10, %v633_v4, inf }
 0x1e1   :  { %639 = vmin.xlane.f32.xlu0 %v638_v61 }
 0x1e6   :  { %v1158_v6 = vpop.xlane.xlu1 %649  ;;  %v458_v7 = vpop.xlane.xlu0 %457 }
 0x1e7   :  { %931 = vrsqrt.f32 %v458_v7  ;;  %vm651_vm11 = vcmp.eq.f32.partialorder %v1126_v63, %v1158_v6  ;;  %vm490_vm13 = vweird.f32 %v458_v7 }
 0x1e8   :  { %v652_v5 = vsel %vm651_vm11, %v647_v9, inf }
 0x1e9   :  { %653 = vmin.xlane.f32.xlu1 %v652_v5 }
 0x1ed   :  { %v932_v10 = vpop.eup %931 }
 0x1ee   :  { %v485_v11 = vmul.f32 %v932_v10, %v458_v7  ;;  %v1163_v12 = vpop.xlane.xlu2 %663  ;;  %v463_v25 = vpop.xlane.xlu1 %462  ;;  %vm491_vm14 = vweird.f32 %v932_v10 }
 0x1ef   :  { %933 = vrsqrt.f32 %v463_v25  ;;  %v473_v43 = vpop.xlane.xlu0 %472  ;;  %vm665_vm12 = vcmp.eq.f32.partialorder %v1134_v32, %v1163_v12  ;;  %vm492_vm15 = vmor %vm490_vm13, %vm491_vm14  ;;  %vm500_vm0 = vweird.f32 %v463_v25 }
 0x1f0   :  { %v486_v15 = vmul.f32 %v932_v10, %v485_v11  ;;  %935 = vrsqrt.f32 %v473_v43  ;;  %v666_v17 = vsel %vm665_vm12, %v661_v13, inf  ;;  %vm520_vm2 = vweird.f32 %v473_v43 }
 0x1f1   :  { %667 = vmin.xlane.f32.xlu2 %v666_v17  ;;  %v614_v13 = vcvt.f32.s32 %v1143_v60 }
 0x1f2   :  { %v487_v63 = vmul.f32 0.5, %v486_v15 }
 0x1f4   :  { %v488_v18 = vsub.f32 1.5, %v487_v63  ;;  %v628_v63 = vcvt.f32.s32 %v1148_v1 }
 0x1f5   :  { %v934_v19 = vpop.eup %933 }
 0x1f6   :  { %v936_v20 = vpop.eup %935  ;;  %v489_v21 = vmul.f32 %v932_v10, %v488_v18  ;;  %v495_v23 = vmul.f32 %v934_v19, %v463_v25  ;;  %v468_v24 = vpop.xlane.xlu2 %467  ;;  %vm501_vm1 = vweird.f32 %v934_v19  ;;  %v629_v18 = vshll.u32 %v628_v63, 16 }
 0x1f7   :  { %v478_v26 = vpop.xlane.xlu1 %477  ;;  %v515_v27 = vmul.f32 %v936_v20, %v473_v43  ;;  %937 = vrsqrt.f32 %v468_v24  ;;  %vm521_vm3 = vweird.f32 %v936_v20  ;;  %vm502_vm4 = vmor %vm500_vm0, %vm501_vm1  ;;  %vm510_vm6 = vweird.f32 %v468_v24 }
 0x1f8   :  { %v493_v28 = vsel %vm492_vm15, %v932_v10, %v489_v21  ;;  %v496_v29 = vmul.f32 %v934_v19, %v495_v23  ;;  %939 = vrsqrt.f32 %v478_v26  ;;  %vm522_vm5 = vmor %vm520_vm2, %vm521_vm3  ;;  %vm530_vm8 = vweird.f32 %v478_v26 }
 0x1f9   :  { %v544_v31 = vmul.f32 %v493_v28, %v1057_v14  ;;  %v516_v32 = vmul.f32 %v936_v20, %v515_v27  ;;  %vm673_vm15 = vcmask 7168  }
 0x1fa   :  { %v497_v33 = vmul.f32 0.5, %v496_v29 }
 0x1fb   :  { %550 = vst [vmem:[#allocation7] sm:$0xff] %v544_v31  ;;  %v517_v53 = vmul.f32 0.5, %v516_v32  ;;  %v670_v31 = vcvt.f32.s32 %v1163_v12 }
 0x1fc   :  { %v498_v34 = vsub.f32 1.5, %v497_v33 }
 0x1fd   :  { %v938_v8 = vpop.eup %937  ;;  %v518_v35 = vsub.f32 1.5, %v517_v53  ;;  %v671_v33 = vshll.u32 %v670_v31, 16 }
 0x1fe   :  { %v940_v36 = vpop.eup %939  ;;  %v499_v37 = vmul.f32 %v934_v19, %v498_v34  ;;  %v505_v39 = vmul.f32 %v938_v8, %v468_v24  ;;  %v483_v40 = vpop.xlane.xlu2 %482  ;;  %vm511_vm7 = vweird.f32 %v938_v8 }
 0x1ff   :  { %v519_v41 = vmul.f32 %v936_v20, %v518_v35  ;;  %v525_v42 = vmul.f32 %v940_v36, %v478_v26  ;;  %941 = vrsqrt.f32 %v483_v40  ;;  %vm531_vm9 = vweird.f32 %v940_v36  ;;  %vm512_vm10 = vmor %vm510_vm6, %vm511_vm7 }
 0x200   :  { %v503_v14 = vsel %vm502_vm4, %v934_v19, %v499_v37  ;;  %v506_v45 = vmul.f32 %v938_v8, %v505_v39  ;;  %vm532_vm11 = vmor %vm530_vm8, %vm531_vm9  ;;  %vm540_vm12 = vweird.f32 %v483_v40  ;;  %v656_v26 = vcvt.f32.s32 %v1158_v6 }
 0x201   :  { %v545_v46 = vmul.f32 %v503_v14, %v1062_v22  ;;  %v523_v48 = vsel %vm522_vm5, %v936_v20, %v519_v41  ;;  %v526_v49 = vmul.f32 %v940_v36, %v525_v42  ;;  %v642_v20 = vcvt.f32.s32 %v1153_v3 }
 0x202   :  { %v547_v50 = vmul.f32 %v523_v48, %v1072_v38  ;;  %v507_v54 = vmul.f32 0.5, %v506_v45  ;;  %v657_v28 = vshll.u32 %v656_v26, 16 }
 0x203   :  { %551 = vst [vmem:[#allocation7 + $0x8] sm:$0xff] %v545_v46  ;;  %v527_v56 = vmul.f32 0.5, %v526_v49  ;;  %v643_v23 = vshll.u32 %v642_v20, 16 }
 0x204   :  { %553 = vst [vmem:[#allocation7 + $0x18] sm:$0xff] %v547_v50  ;;  %v508_v58 = vsub.f32 1.5, %v507_v54 }
 0x205   :  { %v942_v62 = vpop.eup %941  ;;  %v528_v47 = vsub.f32 1.5, %v527_v56 }
 0x206   :  { %v509_v55 = vmul.f32 %v938_v8, %v508_v58  ;;  %v535_v2 = vmul.f32 %v942_v62, %v483_v40  ;;  %vm541_vm13 = vweird.f32 %v942_v62 }
 0x207   :  { %v529_v22 = vmul.f32 %v940_v36, %v528_v47  ;;  %vm542_vm14 = vmor %vm540_vm12, %vm541_vm13 }
 0x208   :  { %v513_v57 = vsel %vm512_vm10, %v938_v8, %v509_v55  ;;  %v536_v59 = vmul.f32 %v942_v62, %v535_v2 }
 0x209   :  { %v546_v38 = vmul.f32 %v513_v57, %v1067_v30  ;;  %v533_v4 = vsel %vm532_vm11, %v940_v36, %v529_v22 }
 0x20a   :  { %v548_v61 = vmul.f32 %v533_v4, %v1077_v44  ;;  %v537_v0 = vmul.f32 0.5, %v536_v59  ;;  %v600_v44 = vcvt.f32.s32 %v1138_v51 }
 0x20b   :  { %552 = vst [vmem:[#allocation7 + $0x10] sm:$0xff] %v546_v38 }
 0x20c   :  { %554 = vst [vmem:[#allocation7 + $0x20] sm:$0xff] %v548_v61  ;;  %v538_v7 = vsub.f32 1.5, %v537_v0  ;;  %v601_v10 = vshll.u32 %v600_v44, 16 }
 0x20e   :  { %v539_v9 = vmul.f32 %v942_v62, %v538_v7 }
 0x210   :  { %v543_v5 = vsel %vm542_vm14, %v942_v62, %v539_v9 }
 0x211   :  { %v549_v30 = vmul.f32 %v543_v5, %v1085_v52  ;;  %v615_v52 = vshll.u32 %v614_v13, 16 }
 0x213   :  { %555 = vst [vmem:[#allocation7 + $0x28] sm:$0xff] %v549_v30 }
 0x214   :  { %692 = dma.vmem_to_hbm [thread:$0]  %s685_s1, 768, %s687_s26, [#allocation4], %s1026_s27, %s1026_s27, %s1027_s28  }
 0x23c   :  { %v598_v16 = vpop.xlane.xlu0 %597 }
 0x23d   :  { %v599_v11 = vcvt.f32.s32 %v598_v16 }
 0x23f   :  { %v602_v25 = vadd.s32 %v601_v10, %v599_v11 }
 0x241   :  { %674 = vst.msk [vmem:[%s1209_s3] sm:$0xff] %vm673_vm15, %v602_v25 }
 0x244   :  { %v612_v43 = vpop.xlane.xlu1 %611 }
 0x245   :  { %v613_v15 = vcvt.f32.s32 %v612_v43 }
 0x247   :  { %v616_v17 = vadd.s32 %v615_v52, %v613_v15 }
 0x249   :  { %675 = vst.msk [vmem:[%s1209_s3 + $0x8] sm:$0xff] %vm673_vm15, %v616_v17 }
 0x24c   :  { %v626_v51 = vpop.xlane.xlu2 %625 }
 0x24d   :  { %v627_v19 = vcvt.f32.s32 %v626_v51 }
 0x24f   :  { %v630_v60 = vadd.s32 %v629_v18, %v627_v19 }
 0x251   :  { %676 = vst.msk [vmem:[%s1209_s3 + $0x10] sm:$0xff] %vm673_vm15, %v630_v60 }
 0x254   :  { %v640_v21 = vpop.xlane.xlu0 %639 }
 0x255   :  { %v641_v24 = vcvt.f32.s32 %v640_v21 }
 0x257   :  { %v644_v1 = vadd.s32 %v643_v23, %v641_v24 }
 0x259   :  { %677 = vst.msk [vmem:[%s1209_s3 + $0x18] sm:$0xff] %vm673_vm15, %v644_v1 }
 0x25c   :  { %v654_v27 = vpop.xlane.xlu1 %653 }
 0x25d   :  { %v655_v29 = vcvt.f32.s32 %v654_v27 }
 0x25f   :  { %v658_v3 = vadd.s32 %v657_v28, %v655_v29 }
 0x261   :  { %678 = vst.msk [vmem:[%s1209_s3 + $0x20] sm:$0xff] %vm673_vm15, %v658_v3 }
 0x264   :  { %v668_v32 = vpop.xlane.xlu2 %667 }
 0x265   :  { %v669_v53 = vcvt.f32.s32 %v668_v32 }
 0x267   :  { %v672_v6 = vadd.s32 %v671_v33, %v669_v53 }
 0x269   :  { %679 = vst.msk [vmem:[%s1209_s3 + $0x28] sm:$0xff] %vm673_vm15, %v672_v6 }
 0x26a   :  { %1019 = dma.done.wait [#allocation4], 768  }
 0x26b   :  { %1020 = vsyncadd [#allocation4], 4294966528 }
 0x26c   :  { %701 = vsyncpa [#allocation3], 1 }
 0x26d   :  { %702 = vsyncpa [#allocation6], 1 }
 0x26e   :  { %703 = vsyncpa [#allocation4], 1 }

</bundles_post_ra>
